<compile_context>
chip_gen: v7x
topology: tpu7x:2x2x1
jax: 0.10.0
libtpu: 0.0.40
codegen_flags: <defaults>
</compile_context>

<pallas_src>
import functools

import jax
import jax.numpy as jnp
from jax.experimental import pallas as pl
from jax.experimental.pallas import tpu as pltpu

IN_FEATURES = 300
HIDDEN = 64
BN_EPS = 1e-5

_FUSED_MAX_ROWS = 8192                 # whole batch lives in VMEM below this
_VMEM_LIMIT_BYTES = 48 * 1024 * 1024   # above scoped defaults, < v7x 64 MiB

_FUSED_PARAMS = pltpu.CompilerParams(vmem_limit_bytes=_VMEM_LIMIT_BYTES)
_TILED_PARAMS = pltpu.CompilerParams(
    dimension_semantics=("parallel",),      # shard batch tiles across TCs (v7x)
    vmem_limit_bytes=_VMEM_LIMIT_BYTES,
)


def _round_up(n, m):
    return ((n + m - 1) // m) * m


# ----------------------------------------------------------------------------
# Fused single-call path (batch fits VMEM): fc1 + BN(train) + ReLU + fc2.
# ----------------------------------------------------------------------------
def _fused_kernel(x_ref, w1_ref, gamma_ref, beta_ref, w2_ref, b2_ref, out_ref,
                  *, inv_batch):
    # fc1 (b1 omitted: exactly cancelled by the BN mean subtraction below).
    h = jnp.dot(x_ref[...], w1_ref[...], preferred_element_type=jnp.float32)
    # Exact full-batch training-mode BatchNorm1d statistics (two-pass: avoids
    # the E[h^2]-mean^2 cancellation concern on the common path).
    mean = jnp.sum(h, axis=0, keepdims=True) * inv_batch
    c = h - mean
    var = jnp.sum(c * c, axis=0, keepdims=True) * inv_batch  # biased, like BN train
    scale = gamma_ref[...] * jax.lax.rsqrt(var + BN_EPS)
    a = jnp.maximum(c * scale + beta_ref[...], 0.0)
    out_ref[...] = (
        jnp.dot(a, w2_ref[...], preferred_element_type=jnp.float32) + b2_ref[...]
    )


# ----------------------------------------------------------------------------
# Tiled large-batch fallback:
#   kernel 1: fc1 + per-tile masked (sum, sum-of-squares) BN partials
#   wrapper : tiny XLA reduce + BN affine folding
#   kernel 2: folded BN + ReLU + fc2
# ----------------------------------------------------------------------------
def _fc1_stats_kernel(x_ref, w1_ref, h_ref, stats_ref, *, batch, tile_rows):
    i = pl.program_id(0)
    h = jnp.dot(x_ref[...], w1_ref[...], preferred_element_type=jnp.float32)
    h_ref[...] = h
    # The last tile may read out-of-bounds garbage rows (no wrapper-side pad);
    # mask them so they contribute exactly 0 to the batch statistics.
    valid = batch - i * tile_rows
    rows = jax.lax.broadcasted_iota(jnp.int32, (tile_rows, 1), 0)
    hm = jnp.where(rows < valid, h, 0.0)
    s = jnp.sum(hm, axis=0, keepdims=True)         # (1, HIDDEN)
    ss = jnp.sum(hm * hm, axis=0, keepdims=True)   # (1, HIDDEN)
    # Lane-dense (1, 128) row: sum in lanes [0,64), sum-of-squares in [64,128).
    stats_ref[...] = jnp.concatenate([s, ss], axis=1)


def _bn_relu_fc2_kernel(h_ref, scale_ref, shift_ref, w2_ref, b2_ref, out_ref):
    a = jnp.maximum(h_ref[...] * scale_ref[...] + shift_ref[...], 0.0)
    out_ref[...] = (
        jnp.dot(a, w2_ref[...], preferred_element_type=jnp.float32) + b2_ref[...]
    )


def mlp_forward(x, w1, b1, gamma, beta, w2, b2, *, block_rows=2048,
                fused_max_rows=_FUSED_MAX_ROWS):
    """Forward pass matching PyTorch MLP (BatchNorm1d in training mode)."""
    # Exact: a bias added before training-mode BN is cancelled by the mean
    # subtraction, so it never reaches the output.
    # TODO(synk): re-add b1 if BN is ever switched to eval/running-stats mode.
    del b1

    batch = x.shape[0]
    num_intents = w2.shape[1]
    gamma_r = gamma.reshape(1, HIDDEN)
    beta_r = beta.reshape(1, HIDDEN)
    b2_r = b2.reshape(1, num_intents)

    # TODO(synk): lay x / w1 out with IN_FEATURES padded to 384 (3*128) at data
    # prep time for lane-aligned DMAs; padding per call would cost an HBM copy.

    if batch <= fused_max_rows:
        # Whole batch VMEM-resident: one launch, no h HBM round trip.
        # Footprint: x ~1200 B/row + h ~256 B/row -> < 12 MiB at the 8192-row
        # cap, fine for every generation (v7x 64 MiB included).
        return pl.pallas_call(
            functools.partial(_fused_kernel, inv_batch=1.0 / batch),
            out_shape=jax.ShapeDtypeStruct((batch, num_intents), jnp.float32),
            compiler_params=_FUSED_PARAMS,
        )(x, w1, gamma_r, beta_r, w2, b2_r)

    # ---- tiled fallback (large batches) -------------------------------------
    tb = min(_round_up(block_rows, 8), _round_up(batch, 8))
    n_tiles = pl.cdiv(batch, tb)

    h, stats = pl.pallas_call(
        functools.partial(_fc1_stats_kernel, batch=batch, tile_rows=tb),
        grid=(n_tiles,),
        in_specs=[
            pl.BlockSpec((tb, IN_FEATURES), lambda i: (i, 0)),
            pl.BlockSpec((IN_FEATURES, HIDDEN), lambda i: (0, 0)),  # VMEM-resident
        ],
        out_specs=(
            pl.BlockSpec((tb, HIDDEN), lambda i: (i, 0)),
            pl.BlockSpec((None, 1, 2 * HIDDEN), lambda i: (i, 0, 0)),
        ),
        out_shape=(
            jax.ShapeDtypeStruct((batch, HIDDEN), jnp.float32),
            jax.ShapeDtypeStruct((n_tiles, 1, 2 * HIDDEN), jnp.float32),
        ),
        compiler_params=_TILED_PARAMS,
    )(x, w1)

    # Tiny full-batch reduction + BN affine folding (a few hundred floats).
    totals = jnp.sum(stats, axis=0)[0]                        # (2*HIDDEN,)
    mean = totals[:HIDDEN] / batch
    var = jnp.maximum(totals[HIDDEN:] / batch - mean * mean, 0.0)
    scale = gamma * jax.lax.rsqrt(var + BN_EPS)
    shift = beta - mean * scale

    out = pl.pallas_call(
        _bn_relu_fc2_kernel,
        grid=(n_tiles,),
        in_specs=[
            pl.BlockSpec((tb, HIDDEN), lambda i: (i, 0)),
            pl.BlockSpec((1, HIDDEN), lambda i: (0, 0)),
            pl.BlockSpec((1, HIDDEN), lambda i: (0, 0)),
            pl.BlockSpec((HIDDEN, num_intents), lambda i: (0, 0)),
            pl.BlockSpec((1, num_intents), lambda i: (0, 0)),
        ],
        out_specs=pl.BlockSpec((tb, num_intents), lambda i: (i, 0)),
        out_shape=jax.ShapeDtypeStruct((batch, num_intents), jnp.float32),
        compiler_params=_TILED_PARAMS,
    )(h, scale.reshape(1, HIDDEN), shift.reshape(1, HIDDEN), w2, b2_r)
    return out


def init_params(key, num_intents):
    k1, k2, k3, k4 = jax.random.split(key, 4)
    lim1 = 1.0 / jnp.sqrt(IN_FEATURES)
    lim2 = 1.0 / jnp.sqrt(HIDDEN)
    w1 = jax.random.uniform(k1, (IN_FEATURES, HIDDEN), jnp.float32, -lim1, lim1)
    b1 = jax.random.uniform(k2, (HIDDEN,), jnp.float32, -lim1, lim1)
    gamma = jnp.ones((HIDDEN,), jnp.float32)   # BatchNorm1d weight init
    beta = jnp.zeros((HIDDEN,), jnp.float32)   # BatchNorm1d bias init
    w2 = jax.random.uniform(k3, (HIDDEN, num_intents), jnp.float32, -lim2, lim2)
    b2 = jax.random.uniform(k4, (num_intents,), jnp.float32, -lim2, lim2)
    return w1, b1, gamma, beta, w2, b2


def mlp_reference(x, w1, b1, gamma, beta, w2, b2):
    # Exact PyTorch-module math (training-mode BatchNorm1d, with b1).
    h = x @ w1 + b1
    m = h.mean(0, keepdims=True)
    v = ((h - m) ** 2).mean(0, keepdims=True)
    h = (h - m) / jnp.sqrt(v + BN_EPS) * gamma + beta
    h = jnp.maximum(h, 0.0)
    return h @ w2 + b2


if __name__ == "__main__":
    key = jax.random.PRNGKey(0)
    kx1, kx2, kp = jax.random.split(key, 3)
    num_intents = 8
    params = init_params(kp, num_intents)

    # Path 1: fused single-call kernel (small batch -> whole batch in VMEM).
    batch_small = 64
    x_small = jax.random.normal(kx1, (batch_small, IN_FEATURES), jnp.float32)
    fused_fwd = jax.jit(mlp_forward)
    out_small = fused_fwd(x_small, *params)
    jax.block_until_ready(out_small)
    ref_small = mlp_reference(x_small, *params)
    assert out_small.shape == (batch_small, num_intents)
    assert jnp.allclose(out_small, ref_small, atol=1e-4, rtol=1e-4), float(
        jnp.max(jnp.abs(out_small - ref_small)))

    # Path 2: tiled fallback (forced); non-multiple batch exercises the
    # in-kernel tail masking (no wrapper-side pad of x).
    batch_tail = 250
    x_tail = jax.random.normal(kx2, (batch_tail, IN_FEATURES), jnp.float32)
    tiled_fwd = jax.jit(
        functools.partial(mlp_forward, block_rows=128, fused_max_rows=0))
    out_tail = tiled_fwd(x_tail, *params)
    jax.block_until_ready(out_tail)
    ref_tail = mlp_reference(x_tail, *params)
    assert out_tail.shape == (batch_tail, num_intents)
    assert jnp.allclose(out_tail, ref_tail, atol=1e-4, rtol=1e-4), float(
        jnp.max(jnp.abs(out_tail - ref_tail)))

    print("KERNEL_OK")
</pallas_src>

<mosaic_0001>
module attributes {stable_mosaic.version = 11 : i64} {
  func.func @_fused_kernel(%arg0: memref<64x300xf32, #tpu.memory_space<vmem>>, %arg1: memref<300x64xf32, #tpu.memory_space<vmem>>, %arg2: memref<1x64xf32, #tpu.memory_space<vmem>>, %arg3: memref<1x64xf32, #tpu.memory_space<vmem>>, %arg4: memref<64x8xf32, #tpu.memory_space<vmem>>, %arg5: memref<1x8xf32, #tpu.memory_space<vmem>>, %arg6: memref<64x8xf32, #tpu.memory_space<vmem>>) attributes {dimension_semantics = [], scalar_prefetch = 0 : i64, scratch_operands = 0 : i64, tpu.core_type = #tpu.core_type<tc>} {
    %c0 = arith.constant 0 : index
    %c0_0 = arith.constant 0 : index
    %0 = vector.load %arg0[%c0, %c0_0] : memref<64x300xf32, #tpu.memory_space<vmem>>, vector<64x300xf32>
    %c0_1 = arith.constant 0 : index
    %c0_2 = arith.constant 0 : index
    %1 = vector.load %arg1[%c0_1, %c0_2] : memref<300x64xf32, #tpu.memory_space<vmem>>, vector<300x64xf32>
    %cst = arith.constant dense<0.000000e+00> : vector<64x64xf32>
    %2 = tpu.matmul %0, %1, %cst {dimension_numbers = #tpu.dot_dimension_numbers<[1], [0], [0], [1], [0, 0, 1, 1], [], []>} : vector<64x300xf32>, vector<300x64xf32>, vector<64x64xf32> -> vector<64x64xf32>
    %cst_3 = arith.constant dense<0.000000e+00> : vector<64xf32>
    %3 = vector.multi_reduction <add>, %2, %cst_3 [0] : vector<64x64xf32> to vector<64xf32>
    %4 = vector.shape_cast %3 : vector<64xf32> to vector<1x64xf32>
    %cst_4 = arith.constant 1.562500e-02 : f32
    %5 = vector.broadcast %cst_4 : f32 to vector<1x64xf32>
    %6 = arith.mulf %4, %5 : vector<1x64xf32>
    %7 = vector.broadcast %6 : vector<1x64xf32> to vector<64x64xf32>
    %8 = arith.subf %2, %7 : vector<64x64xf32>
    %9 = arith.mulf %8, %8 : vector<64x64xf32>
    %cst_5 = arith.constant dense<0.000000e+00> : vector<64xf32>
    %10 = vector.multi_reduction <add>, %9, %cst_5 [0] : vector<64x64xf32> to vector<64xf32>
    %11 = vector.shape_cast %10 : vector<64xf32> to vector<1x64xf32>
    %cst_6 = arith.constant 1.562500e-02 : f32
    %12 = vector.broadcast %cst_6 : f32 to vector<1x64xf32>
    %13 = arith.mulf %11, %12 : vector<1x64xf32>
    %c0_7 = arith.constant 0 : index
    %c0_8 = arith.constant 0 : index
    %14 = vector.load %arg2[%c0_7, %c0_8] : memref<1x64xf32, #tpu.memory_space<vmem>>, vector<1x64xf32>
    %cst_9 = arith.constant 9.99999974E-6 : f32
    %15 = vector.broadcast %cst_9 : f32 to vector<1x64xf32>
    %16 = arith.addf %13, %15 : vector<1x64xf32>
    %17 = math.rsqrt %16 : vector<1x64xf32>
    %18 = arith.mulf %14, %17 : vector<1x64xf32>
    %19 = vector.broadcast %18 : vector<1x64xf32> to vector<64x64xf32>
    %20 = arith.mulf %8, %19 : vector<64x64xf32>
    %c0_10 = arith.constant 0 : index
    %c0_11 = arith.constant 0 : index
    %21 = vector.load %arg3[%c0_10, %c0_11] : memref<1x64xf32, #tpu.memory_space<vmem>>, vector<1x64xf32>
    %22 = vector.broadcast %21 : vector<1x64xf32> to vector<64x64xf32>
    %23 = arith.addf %20, %22 : vector<64x64xf32>
    %cst_12 = arith.constant 0.000000e+00 : f32
    %24 = vector.broadcast %cst_12 : f32 to vector<64x64xf32>
    %25 = arith.maximumf %23, %24 : vector<64x64xf32>
    %c0_13 = arith.constant 0 : index
    %c0_14 = arith.constant 0 : index
    %26 = vector.load %arg4[%c0_13, %c0_14] : memref<64x8xf32, #tpu.memory_space<vmem>>, vector<64x8xf32>
    %cst_15 = arith.constant dense<0.000000e+00> : vector<64x8xf32>
    %27 = tpu.matmul %25, %26, %cst_15 {dimension_numbers = #tpu.dot_dimension_numbers<[1], [0], [0], [1], [0, 0, 1, 1], [], []>} : vector<64x64xf32>, vector<64x8xf32>, vector<64x8xf32> -> vector<64x8xf32>
    %c0_16 = arith.constant 0 : index
    %c0_17 = arith.constant 0 : index
    %28 = vector.load %arg5[%c0_16, %c0_17] : memref<1x8xf32, #tpu.memory_space<vmem>>, vector<1x8xf32>
    %29 = vector.broadcast %28 : vector<1x8xf32> to vector<64x8xf32>
    %30 = arith.addf %27, %29 : vector<64x8xf32>
    %c0_18 = arith.constant 0 : index
    %c0_19 = arith.constant 0 : index
    %31 = vector.load %arg6[%c0_18, %c0_19] : memref<64x8xf32, #tpu.memory_space<vmem>>, vector<64x8xf32>
    tpu.vector_store %arg6[%c0_18, %c0_19], %30 {strides = array<i32>} : memref<64x8xf32, #tpu.memory_space<vmem>>, vector<64x8xf32>,
    return
  }
}

</mosaic_0001>

<bundles_post_ra>
// kernel: mlp_forward.1
= control target key start
LH: loop header
LB: loop body
LE: loop exit
PB: predicated region body
PF: predicated region fallthrough
CT: control target
= control target key end

     0   :  { %vm110_vm0 = vcmask 1043456   ;;  %vm85_vm1 = vcmask 359424   ;;  %vm805_vm2 = vmmov 1   ;;  %vm324_vm4 = vcmask 523264   ;;  %s1125_s1 = inlined_call_operand.vmem [shape: f32[300,64], index: 1, kind: input, shape index: {}]   ;;  %s1126_s0 = inlined_call_operand.vmem [shape: f32[64,300], index: 0, kind: input, shape index: {}]   ;;  %s1127_s4 = inlined_call_operand.vmem [shape: f32[64,8], index: 4, kind: input, shape index: {}]   ;;  %s1128_s2 = inlined_call_operand.vmem [shape: f32[1,64], index: 2, kind: input, shape index: {}]   ;;  %s1129_s3 = inlined_call_operand.vmem [shape: f32[1,64], index: 3, kind: input, shape index: {}]   ;;  %s1130_s5 = inlined_call_operand.vmem [shape: f32[1,8], index: 5, kind: input, shape index: {}]   ;;  %s1131_s6 = inlined_call_operand.vmem [shape: f32[64,8], index: 6, kind: output, shape index: {}]  }
   0x1   :  { %v63_v0 = vld [vmem:[%s1125_s1 + $0x80] sm:$0xff]  ;;  %v64_v1 = vld [vmem:[%s1125_s1 + $0x88] sm:$0xff]  ;;  %v65_v5 = vld [vmem:[%s1125_s1 + $0x90] sm:$0xff]  ;;  %vm570_vm5 = vcmask 64512  }
   0x2   :  { %v47_v2 = vld [vmem:[%s1125_s1] sm:$0xff]  ;;  %v740_v3 = vpack.c.bf16 %v64_v1, %v63_v0  ;;  %v48_v4 = vld [vmem:[%s1125_s1 + $0x8] sm:$0xff]  ;;  %v66_v6 = vld [vmem:[%s1125_s1 + $0x98] sm:$0xff] }
   0x3   :  { %v742_v7 = vpack.c.bf16 %v48_v4, %v47_v2  ;;  %v744_v8 = vpack.c.bf16 %v66_v6, %v65_v5  ;;  %v49_v9 = vld [vmem:[%s1125_s1 + $0x10] sm:$0xff]  ;;  %v50_v10 = vld [vmem:[%s1125_s1 + $0x18] sm:$0xff]  ;;  %v67_v11 = vld [vmem:[%s1125_s1 + $0xa0] sm:$0xff] }
   0x4   :  { %741 = vmatprep.subr.bf16.mxu0 %v740_v3  ;;  %v68_v12 = vld [vmem:[%s1125_s1 + $0xa8] sm:$0xff]  ;;  %v746_v13 = vpack.c.bf16 %v50_v10, %v49_v9  ;;  %v51_v15 = vld [vmem:[%s1125_s1 + $0x20] sm:$0xff]  ;;  %v69_v17 = vld [vmem:[%s1125_s1 + $0xb0] sm:$0xff] }
   0x5   :  { %743 = vmatpush3.bf16.msra.mxu0 %v742_v7  ;;  %v748_v14 = vpack.c.bf16 %v68_v12, %v67_v11  ;;  %v52_v16 = vld [vmem:[%s1125_s1 + $0x28] sm:$0xff]  ;;  %v70_v18 = vld [vmem:[%s1125_s1 + $0xb8] sm:$0xff]  ;;  %v79_v20 = vld [vmem:[%s1125_s1 + $0x100] sm:$0xff] }
   0x6   :  { %745 = vmatprep.subr.bf16.mxu0 %v744_v8  ;;  %v750_v19 = vpack.c.bf16 %v52_v16, %v51_v15  ;;  %v80_v21 = vld [vmem:[%s1125_s1 + $0x108] sm:$0xff]  ;;  %v752_v22 = vpack.c.bf16 %v70_v18, %v69_v17  ;;  %v53_v23 = vld [vmem:[%s1125_s1 + $0x30] sm:$0xff]  ;;  %v54_v24 = vld [vmem:[%s1125_s1 + $0x38] sm:$0xff] }
   0x7   :  { %v71_v25 = vld [vmem:[%s1125_s1 + $0xc0] sm:$0xff]  ;;  %v772_v26 = vpack.c.bf16 %v80_v21, %v79_v20  ;;  %v72_v27 = vld [vmem:[%s1125_s1 + $0xc8] sm:$0xff]  ;;  %v81_v28 = vld [vmem:[%s1125_s1 + $0x110] sm:$0xff]  ;;  %v754_v31 = vpack.c.bf16 %v54_v24, %v53_v23 }
   0x8   :  { %v82_v29 = vld [vmem:[%s1125_s1 + $0x118] sm:$0xff]  ;;  %v55_v32 = vld [vmem:[%s1125_s1 + $0x40] sm:$0xff]  ;;  %v84_v34 = vld [vmem:[%s1125_s1 + $0x128] sm:$0xf]  ;;  %v756_v35 = vpack.c.bf16 %v72_v27, %v71_v25 }
   0x9   :  { %747 = vmatpush3.bf16.msra.mxu0 %v746_v13  ;;  %773 = vmatprep.subr.bf16.mxu1 %v772_v26  ;;  %v776_v30 = vpack.c.bf16 %v82_v29, %v81_v28  ;;  %v83_v33 = vld [vmem:[%s1125_s1 + $0x120] sm:$0xff]  ;;  %v56_v36 = vld [vmem:[%s1125_s1 + $0x48] sm:$0xff]  ;;  %v25_v39 = vld [vmem:[%s1126_s0 + $0x10] sm:$0xff] }
   0xa   :  { %749 = vmatprep.subr.bf16.mxu0 %v748_v14  ;;  %775 = vmatpush3.bf16.msra.mxu1 %v772_v26  ;;  %v780_v37 = vpack.c.bf16 %v84_v34, %v83_v33  ;;  %v24_v38 = vld [vmem:[%s1126_s0 + $0x8] sm:$0xff]  ;;  %v73_v40 = vld [vmem:[%s1125_s1 + $0xd0] sm:$0xff]  ;;  %v74_v41 = vld [vmem:[%s1125_s1 + $0xd8] sm:$0xff]  ;;  %v758_v42 = vpack.c.bf16 %v56_v36, %v55_v32 }
   0xb   :  { %777 = vmatprep.subr.bf16.mxu1 %v776_v30  ;;  %vm781_vm3 = vmpackc.low %vm110_vm0, %vm805_vm2  ;;  %178 = vmatprep.mubr.f32.mxu0 %v24_v38  ;;  %v760_v43 = vpack.c.bf16 %v74_v41, %v73_v40  ;;  %v57_v44 = vld [vmem:[%s1125_s1 + $0x50] sm:$0xff]  ;;  %v58_v45 = vld [vmem:[%s1125_s1 + $0x58] sm:$0xff] }
   0xc   :  { %700 = vmatprep.mubr.msk.f32.mxu1 %vm85_vm1, %v25_v39  ;;  %v75_v46 = vld [vmem:[%s1125_s1 + $0xe0] sm:$0xff]  ;;  %v76_v47 = vld [vmem:[%s1125_s1 + $0xe8] sm:$0xff]  ;;  %v762_v48 = vpack.c.bf16 %v58_v45, %v57_v44  ;;  %v77_v54 = vld [vmem:[%s1125_s1 + $0xf0] sm:$0xff] }
   0xd   :  { %751 = vmatpush3.bf16.msra.mxu0 %v750_v19  ;;  %v28_v49 = vld [vmem:[%s1126_s0 + $0x28] sm:$0xff]  ;;  %v764_v50 = vpack.c.bf16 %v76_v47, %v75_v46  ;;  %v59_v51 = vld [vmem:[%s1125_s1 + $0x60] sm:$0xff]  ;;  %v78_v55 = vld [vmem:[%s1125_s1 + $0xf8] sm:$0xff] }
   0xe   :  { %753 = vmatprep.subr.bf16.mxu0 %v752_v22  ;;  %779 = vmatpush3.bf16.msra.mxu1 %v776_v30  ;;  %v60_v52 = vld [vmem:[%s1125_s1 + $0x68] sm:$0xff]  ;;  %v31_v53 = vld [vmem:[%s1126_s0 + $0x40] sm:$0xff]  ;;  %v34_v57 = vld [vmem:[%s1126_s0 + $0x58] sm:$0xff]  ;;  %v768_v58 = vpack.c.bf16 %v78_v55, %v77_v54 }
   0xf   :  { %782 = vmatprep.subr.msk.bf16.mxu1 %vm781_vm3, %v780_v37  ;;  %v766_v56 = vpack.c.bf16 %v60_v52, %v59_v51  ;;  %v61_v59 = vld [vmem:[%s1125_s1 + $0x70] sm:$0xff]  ;;  %v62_v60 = vld [vmem:[%s1125_s1 + $0x78] sm:$0xff]  ;;  %v40_v63 = vld [vmem:[%s1126_s0 + $0x88] sm:$0xff] }
  0x10   :  { %v37_v61 = vld [vmem:[%s1126_s0 + $0x70] sm:$0xff]  ;;  %v770_v62 = vpack.c.bf16 %v62_v60, %v61_v59  ;;  %v43_v0 = vld [vmem:[%s1126_s0 + $0xa0] sm:$0xff]  ;;  %v46_v2 = vld [vmem:[%s1126_s0 + $0xb8] sm:$0xff] }
  0x11   :  { %755 = vmatpush3.bf16.msra.mxu0 %v754_v31  ;;  %v23_v1 = vld [vmem:[%s1126_s0] sm:$0xff]  ;;  %v26_v4 = vld [vmem:[%s1126_s0 + $0x18] sm:$0xff]  ;;  %v29_v6 = vld [vmem:[%s1126_s0 + $0x30] sm:$0xff] }
  0x12   :  { %757 = vmatprep.subr.bf16.mxu0 %v756_v35  ;;  %785 = vmatpush3.bf16.msk.msra.mxu1 %vm781_vm3, %v780_v37  ;;  %v27_v3 = vld [vmem:[%s1126_s0 + $0x20] sm:$0xff]  ;;  %v30_v5 = vld [vmem:[%s1126_s0 + $0x38] sm:$0xff]  ;;  %v33_v7 = vld [vmem:[%s1126_s0 + $0x50] sm:$0xff] }
  0x13   :  { %v32_v8 = vld [vmem:[%s1126_s0 + $0x48] sm:$0xff]  ;;  %v35_v10 = vld [vmem:[%s1126_s0 + $0x60] sm:$0xff]  ;;  %v38_v12 = vld [vmem:[%s1126_s0 + $0x78] sm:$0xff] }
  0x14   :  { %v36_v9 = vld [vmem:[%s1126_s0 + $0x68] sm:$0xff]  ;;  %v39_v11 = vld [vmem:[%s1126_s0 + $0x80] sm:$0xff]  ;;  %v42_v13 = vld [vmem:[%s1126_s0 + $0x98] sm:$0xff] }
  0x15   :  { %759 = vmatpush3.bf16.msra.mxu0 %v758_v42  ;;  %701 = vmatmul.mubr.msk.f32.vlgmr.msra.gmra.mrb[0].mxu1 %vm85_vm1, %v28_v49  ;;  %v41_v14 = vld [vmem:[%s1126_s0 + $0x90] sm:$0xff]  ;;  %v44_v16 = vld [vmem:[%s1126_s0 + $0xa8] sm:$0xff]  ;;  %v426_v17 = vld [vmem:[%s1127_s4] sm:$0xff] }
  0x16   :  { %761 = vmatprep.subr.bf16.mxu0 %v760_v43  ;;  %703 = vmatprep.mubr.msk.f32.mxu1 %vm85_vm1, %v31_v53  ;;  %v45_v15 = vld [vmem:[%s1126_s0 + $0xb0] sm:$0xff]  ;;  %v427_v18 = vld [vmem:[%s1127_s4 + $0x8] sm:$0xff]  ;;  %v429_v21 = vld [vmem:[%s1127_s4 + $0x18] sm:$0xff] }
  0x17   :  { %v786_v19 = vpack.c.bf16 %v427_v18, %v426_v17  ;;  %v428_v20 = vld [vmem:[%s1127_s4 + $0x10] sm:$0xff]  ;;  %v430_v23 = vld [vmem:[%s1127_s4 + $0x20] sm:$0xff]  ;;  %v431_v24 = vld [vmem:[%s1127_s4 + $0x28] sm:$0xff] }
  0x18   :  { %v790_v22 = vpack.c.bf16 %v429_v21, %v428_v20  ;;  %v794_v25 = vpack.c.bf16 %v431_v24, %v430_v23  ;;  %v432_v26 = vld [vmem:[%s1127_s4 + $0x30] sm:$0xff]  ;;  %v433_v27 = vld [vmem:[%s1127_s4 + $0x38] sm:$0xff] }
  0x19   :  { %763 = vmatpush3.bf16.msra.mxu0 %v762_v48  ;;  %704 = vmatmul.mubr.msk.f32.gmra.mrb[2].mxu1 %vm85_vm1, %v34_v57  ;;  %v798_v28 = vpack.c.bf16 %v433_v27, %v432_v26 }
  0x1a   :  { %765 = vmatprep.subr.bf16.mxu0 %v764_v50  ;;  %706 = vmatprep.mubr.msk.f32.mxu1 %vm85_vm1, %v37_v61 }
  0x1b   :  { %787 = vmatprep.subr.bf16.mxu1 %v786_v19 }
  0x1c   :  { %789 = vmatpush3.bf16.msra.mxu1 %v786_v19 }
  0x1d   :  { %767 = vmatpush3.bf16.msra.mxu0 %v766_v56  ;;  %707 = vmatmul.mubr.msk.f32.gmra.mrb[4].mxu1 %vm85_vm1, %v40_v63 }
  0x1e   :  { %769 = vmatprep.subr.bf16.mxu0 %v768_v58  ;;  %709 = vmatprep.mubr.msk.f32.mxu1 %vm85_vm1, %v43_v0 }
  0x1f   :  { %791 = vmatprep.subr.bf16.mxu1 %v790_v22 }
  0x20   :  { %793 = vmatpush3.bf16.msra.mxu1 %v790_v22 }
  0x21   :  { %771 = vmatpush3.bf16.msra.mxu0 %v770_v62  ;;  %710 = vmatmul.mubr.msk.f32.gmra.mrb[6].mxu1 %vm85_vm1, %v46_v2 }
  0x22   :  { %795 = vmatprep.subr.bf16.mxu1 %v794_v25 }
  0x24   :  { %179 = vmatmul.mubr.f32.vlgmr.msra.gmra.mrb[0].mxu0 %v23_v1  ;;  %797 = vmatpush3.bf16.msra.mxu1 %v794_v25 }
  0x25   :  { %183 = vmatprep.mubr.f32.mxu0 %v27_v3  ;;  %799 = vmatprep.subr.bf16.mxu1 %v798_v28 }
  0x28   :  { %184 = vmatmul.mubr.f32.gmra.mrb[2].mxu0 %v26_v4  ;;  %801 = vmatpush3.bf16.msra.mxu1 %v798_v28 }
  0x29   :  { %188 = vmatprep.mubr.f32.mxu0 %v30_v5 }
  0x2c   :  { %189 = vmatmul.mubr.f32.gmra.mrb[4].mxu0 %v29_v6 }
  0x2d   :  { %193 = vmatprep.mubr.f32.mxu0 %v33_v7 }
  0x30   :  { %194 = vmatmul.mubr.f32.gmra.mrb[6].mxu0 %v32_v8 }
  0x31   :  { %198 = vmatprep.mubr.f32.mxu0 %v36_v9 }
  0x34   :  { %199 = vmatmul.mubr.f32.gmra.mrb[8].mxu0 %v35_v10 }
  0x35   :  { %203 = vmatprep.mubr.f32.mxu0 %v39_v11 }
  0x38   :  { %204 = vmatmul.mubr.f32.gmra.mrb[10].mxu0 %v38_v12 }
  0x39   :  { %208 = vmatprep.mubr.f32.mxu0 %v42_v13 }
  0x3c   :  { %209 = vmatmul.mubr.f32.gmra.mrb[12].mxu0 %v41_v14 }
  0x3d   :  { %213 = vmatprep.mubr.f32.mxu0 %v45_v15 }
  0x40   :  { %214 = vmatmul.mubr.f32.gmra.mrb[14].mxu0 %v44_v16 }
  0xe8   :  { %v702_v29 = vpop.f32.mrb[0].mxu1 }
  0xe9   :  { %v285_v30 = vpop.f32.mrb[1].mxu1 }
  0xec   :  { %v705_v31 = vpop.f32.mrb[2].mxu1 }
  0xed   :  { %v295_v32 = vpop.f32.mrb[3].mxu1 }
  0xf0   :  { %v708_v33 = vpop.f32.mrb[4].mxu1 }
  0xf1   :  { %v305_v34 = vpop.f32.mrb[5].mxu1 }
  0xf4   :  { %v711_v36 = vpop.f32.mrb[6].mxu1 }
  0xf5   :  { %v315_v38 = vpop.f32.mrb[7].mxu1 }
  0xf7   :  { %v634_v35 = vpop.f32.mrb[0].mxu0 }
  0xf8   :  { %v635_v37 = vpop.f32.mrb[1].mxu0 }
  0xf9   :  { %v636_v39 = vadd.f32 %v635_v37, %v634_v35 }
  0xfb   :  { %v286_v40 = vadd.f32 %v636_v39, %v285_v30  ;;  %v637_v41 = vpop.f32.mrb[2].mxu0 }
  0xfc   :  { %v638_v42 = vpop.f32.mrb[3].mxu0 }
  0xfd   :  { %v639_v43 = vadd.f32 %v638_v42, %v637_v41  ;;  %v325_v47 = vsel %vm324_vm4, %v286_v40, 0.0 }
  0xff   :  { %v291_v44 = vadd.f32 %v702_v29, %v639_v43  ;;  %v640_v45 = vpop.f32.mrb[4].mxu0 }
 0x100   :  { %v641_v46 = vpop.f32.mrb[5].mxu0 }
 0x101   :  { %v326_v48 = vsel %vm324_vm4, %v291_v44, 0.0  ;;  %v642_v49 = vadd.f32 %v641_v46, %v640_v45 }
 0x102   :  { %v327_v50 = vadd.f32 %v326_v48, %v325_v47 }
 0x103   :  { %v296_v51 = vadd.f32 %v642_v49, %v295_v32  ;;  %v643_v52 = vpop.f32.mrb[6].mxu0 }
 0x104   :  { %v644_v53 = vpop.f32.mrb[7].mxu0 }
 0x105   :  { %v328_v54 = vsel %vm324_vm4, %v296_v51, 0.0  ;;  %v645_v55 = vadd.f32 %v644_v53, %v643_v52 }
 0x106   :  { %v329_v56 = vadd.f32 %v328_v54, %v327_v50 }
 0x107   :  { %v301_v57 = vadd.f32 %v705_v31, %v645_v55  ;;  %v646_v58 = vpop.f32.mrb[8].mxu0 }
 0x108   :  { %v647_v59 = vpop.f32.mrb[9].mxu0 }
 0x109   :  { %v330_v60 = vsel %vm324_vm4, %v301_v57, 0.0  ;;  %v648_v61 = vadd.f32 %v647_v59, %v646_v58 }
 0x10a   :  { %v331_v62 = vadd.f32 %v330_v60, %v329_v56 }
 0x10b   :  { %v306_v63 = vadd.f32 %v648_v61, %v305_v34  ;;  %v649_v0 = vpop.f32.mrb[10].mxu0 }
 0x10c   :  { %v650_v1 = vpop.f32.mrb[11].mxu0 }
 0x10d   :  { %v332_v2 = vsel %vm324_vm4, %v306_v63, 0.0  ;;  %v651_v3 = vadd.f32 %v650_v1, %v649_v0 }
 0x10e   :  { %v333_v4 = vadd.f32 %v332_v2, %v331_v62  ;;  %v390_v2 = vlaneseq }
 0x10f   :  { %v311_v5 = vadd.f32 %v708_v33, %v651_v3  ;;  %v652_v6 = vpop.f32.mrb[12].mxu0 }
 0x110   :  { %v653_v7 = vpop.f32.mrb[13].mxu0  ;;  %v391_v3 = vshrl.u32 %v390_v2, 7 }
 0x111   :  { %v334_v8 = vsel %vm324_vm4, %v311_v5, 0.0  ;;  %v654_v9 = vadd.f32 %v653_v7, %v652_v6 }
 0x112   :  { %v335_v10 = vadd.f32 %v334_v8, %v333_v4  ;;  %v385_v4 = vld [vmem:[%s1128_s2] sm:$0x1] }
 0x113   :  { %v316_v11 = vadd.f32 %v654_v9, %v315_v38  ;;  %v655_v12 = vpop.f32.mrb[14].mxu0  ;;  %v592_v9 = vld [vmem:[%s1129_s3] ss:$0 sm:$0xff] }
 0x114   :  { %v656_v13 = vpop.f32.mrb[15].mxu0 }
 0x115   :  { %v336_v14 = vsel %vm324_vm4, %v316_v11, 0.0  ;;  %v657_v15 = vadd.f32 %v656_v13, %v655_v12 }
 0x116   :  { %v337_v16 = vadd.f32 %v336_v14, %v335_v10 }
 0x117   :  { %v321_v17 = vadd.f32 %v711_v36, %v657_v15 }
 0x119   :  { %v338_v18 = vsel %vm324_vm4, %v321_v17, 0.0 }
 0x11a   :  { %v339_v19 = vadd.f32 %v338_v18, %v337_v16 }
 0x11c   :  { %v340_v20 = vrot.slane %v339_v19, 4 }
 0x11e   :  { %v341_v21 = vadd.f32 %v340_v20, %v339_v19 }
 0x120   :  { %v342_v22 = vrot.slane %v341_v21, 2 }
 0x122   :  { %v343_v23 = vadd.f32 %v342_v22, %v341_v21 }
 0x124   :  { %v344_v24 = vrot.slane %v343_v23, 1 }
 0x126   :  { %v345_v25 = vadd.f32 %v344_v24, %v343_v23 }
 0x128   :  { %v346_v26 = vmul.f32 0.015625, %v345_v25 }
 0x12a   :  { %v347_v27 = vsub.f32 %v286_v40, %v346_v26  ;;  %v348_v28 = vsub.f32 %v291_v44, %v346_v26  ;;  %v349_v29 = vsub.f32 %v296_v51, %v346_v26  ;;  %v350_v30 = vsub.f32 %v301_v57, %v346_v26 }
 0x12b   :  { %v351_v31 = vsub.f32 %v306_v63, %v346_v26  ;;  %v352_v32 = vsub.f32 %v311_v5, %v346_v26  ;;  %v353_v33 = vsub.f32 %v316_v11, %v346_v26  ;;  %v354_v34 = vsub.f32 %v321_v17, %v346_v26 }
 0x12c   :  { %v355_v35 = vmul.f32 %v347_v27, %v347_v27  ;;  %v356_v36 = vmul.f32 %v348_v28, %v348_v28  ;;  %v357_v37 = vmul.f32 %v349_v29, %v349_v29  ;;  %v358_v38 = vmul.f32 %v350_v30, %v350_v30 }
 0x12d   :  { %v359_v43 = vmul.f32 %v351_v31, %v351_v31  ;;  %v360_v44 = vmul.f32 %v352_v32, %v352_v32  ;;  %v361_v48 = vmul.f32 %v353_v33, %v353_v33  ;;  %v362_v51 = vmul.f32 %v354_v34, %v354_v34 }
 0x12e   :  { %v363_v39 = vsel %vm324_vm4, %v355_v35, 0.0  ;;  %v364_v41 = vsel %vm324_vm4, %v356_v36, 0.0  ;;  %v366_v45 = vsel %vm324_vm4, %v357_v37, 0.0  ;;  %v368_v46 = vsel %vm324_vm4, %v358_v38, 0.0 }
 0x12f   :  { %v365_v42 = vadd.f32 %v364_v41, %v363_v39  ;;  %v370_v49 = vsel %vm324_vm4, %v359_v43, 0.0  ;;  %v372_v52 = vsel %vm324_vm4, %v360_v44, 0.0  ;;  %v374_v54 = vsel %vm324_vm4, %v361_v48, 0.0 }
 0x130   :  { %v376_v56 = vsel %vm324_vm4, %v362_v51, 0.0  ;;  %v392_v5 = vsub.s32 0, %v391_v3 }
 0x131   :  { %v367_v40 = vadd.f32 %v366_v45, %v365_v42 }
 0x133   :  { %v369_v47 = vadd.f32 %v368_v46, %v367_v40 }
 0x135   :  { %v371_v50 = vadd.f32 %v370_v49, %v369_v47 }
 0x137   :  { %v373_v53 = vadd.f32 %v372_v52, %v371_v50 }
 0x139   :  { %v375_v55 = vadd.f32 %v374_v54, %v373_v53 }
 0x13b   :  { %v377_v57 = vadd.f32 %v376_v56, %v375_v55 }
 0x13d   :  { %v378_v58 = vrot.slane %v377_v57, 4 }
 0x13f   :  { %v379_v59 = vadd.f32 %v378_v58, %v377_v57 }
 0x141   :  { %v380_v60 = vrot.slane %v379_v59, 2 }
 0x143   :  { %v381_v61 = vadd.f32 %v380_v60, %v379_v59 }
 0x145   :  { %v382_v62 = vrot.slane %v381_v61, 1 }
 0x147   :  { %v383_v63 = vadd.f32 %v382_v62, %v381_v61 }
 0x149   :  { %v384_v0 = vmul.f32 0.015625, %v383_v63 }
 0x14b   :  { %v386_v1 = vadd.f32 1e-05, %v384_v0 }
 0x14d   :  { %803 = vrsqrt.f32 %v386_v1 }
 0x157   :  { %v804_v6 = vpop.eup %803 }
 0x158   :  { %v388_v7 = vmul.f32 %v804_v6, %v385_v4 }
 0x15a   :  { %v393_v8 = vrot.slane %v388_v7, %v392_v5 }
 0x15c   :  { %v402_v10 = vmul.f32 %v393_v8, %v354_v34  ;;  %v395_v11 = vmul.f32 %v393_v8, %v347_v27  ;;  %v396_v12 = vmul.f32 %v393_v8, %v348_v28  ;;  %v397_v13 = vmul.f32 %v393_v8, %v349_v29  ;;  %v593_v34 = vld [vmem:[%s1130_s5] ss:$0 sm:$0xff] }
 0x15d   :  { %v398_v14 = vmul.f32 %v393_v8, %v350_v30  ;;  %v399_v15 = vmul.f32 %v393_v8, %v351_v31  ;;  %v400_v16 = vmul.f32 %v393_v8, %v352_v32  ;;  %v401_v17 = vmul.f32 %v393_v8, %v353_v33 }
 0x15e   :  { %v410_v18 = vadd.f32 %v592_v9, %v395_v11  ;;  %v411_v19 = vadd.f32 %v592_v9, %v396_v12  ;;  %v412_v20 = vadd.f32 %v592_v9, %v397_v13  ;;  %v417_v31 = vadd.f32 %v592_v9, %v402_v10 }
 0x15f   :  { %v413_v23 = vadd.f32 %v592_v9, %v398_v14  ;;  %v414_v25 = vadd.f32 %v592_v9, %v399_v15  ;;  %v415_v27 = vadd.f32 %v592_v9, %v400_v16  ;;  %v416_v29 = vadd.f32 %v592_v9, %v401_v17 }
 0x160   :  { %v418_v21 = vmax.f32 %v410_v18, 0.0  ;;  %v419_v22 = vmax.f32 %v411_v19, 0.0  ;;  %v420_v24 = vmax.f32 %v412_v20, 0.0  ;;  %v425_v33 = vmax.f32 %v417_v31, 0.0 }
 0x161   :  { %v421_v26 = vmax.f32 %v413_v23, 0.0  ;;  %v422_v28 = vmax.f32 %v414_v25, 0.0  ;;  %v423_v30 = vmax.f32 %v415_v27, 0.0  ;;  %v424_v32 = vmax.f32 %v416_v29, 0.0 }
 0x162   :  { %728 = vmatprep.mubr.msk.f32.mxu1 %vm324_vm4, %v418_v21 }
 0x163   :  { %729 = vmatmul.mubr.msk.f32.vlgmr.msra.gmra.mrb[8].mxu1 %vm324_vm4, %v419_v22 }
 0x164   :  { %731 = vmatprep.mubr.msk.f32.mxu1 %vm324_vm4, %v420_v24 }
 0x167   :  { %732 = vmatmul.mubr.msk.f32.gmra.mrb[10].mxu1 %vm324_vm4, %v421_v26 }
 0x168   :  { %734 = vmatprep.mubr.msk.f32.mxu1 %vm324_vm4, %v422_v28 }
 0x16b   :  { %735 = vmatmul.mubr.msk.f32.gmra.mrb[12].mxu1 %vm324_vm4, %v423_v30 }
 0x16c   :  { %737 = vmatprep.mubr.msk.f32.mxu1 %vm324_vm4, %v424_v32 }
 0x16f   :  { %738 = vmatmul.mubr.msk.f32.gmra.mrb[14].mxu1 %vm324_vm4, %v425_v33 }
 0x236   :  { %v730_v35 = vpop.f32.mrb[8].mxu1 }
 0x237   :  { %v537_v36 = vadd.f32 %v730_v35, %v593_v34  ;;  %v531_v37 = vpop.f32.mrb[9].mxu1 }
 0x238   :  { %v532_v38 = vadd.f32 %v593_v34, %v531_v37 }
 0x239   :  { %572 = vst.msk [vmem:[%s1131_s6 + $0x8] sm:$0xff] %vm570_vm5, %v537_v36 }
 0x23a   :  { %571 = vst.msk [vmem:[%s1131_s6] sm:$0xff] %vm570_vm5, %v532_v38  ;;  %v733_v39 = vpop.f32.mrb[10].mxu1 }
 0x23b   :  { %v547_v41 = vadd.f32 %v733_v39, %v593_v34  ;;  %v541_v42 = vpop.f32.mrb[11].mxu1 }
 0x23c   :  { %v542_v43 = vadd.f32 %v593_v34, %v541_v42 }
 0x23d   :  { %574 = vst.msk [vmem:[%s1131_s6 + $0x18] sm:$0xff] %vm570_vm5, %v547_v41 }
 0x23e   :  { %573 = vst.msk [vmem:[%s1131_s6 + $0x10] sm:$0xff] %vm570_vm5, %v542_v43  ;;  %v736_v45 = vpop.f32.mrb[12].mxu1 }
 0x23f   :  { %v557_v40 = vadd.f32 %v736_v45, %v593_v34  ;;  %v551_v44 = vpop.f32.mrb[13].mxu1 }
 0x240   :  { %v552_v46 = vadd.f32 %v593_v34, %v551_v44 }
 0x241   :  { %576 = vst.msk [vmem:[%s1131_s6 + $0x28] sm:$0xff] %vm570_vm5, %v557_v40 }
 0x242   :  { %575 = vst.msk [vmem:[%s1131_s6 + $0x20] sm:$0xff] %vm570_vm5, %v552_v46  ;;  %v739_v47 = vpop.f32.mrb[14].mxu1 }
 0x243   :  { %v567_v48 = vadd.f32 %v739_v47, %v593_v34  ;;  %v561_v49 = vpop.f32.mrb[15].mxu1 }
 0x244   :  { %v562_v50 = vadd.f32 %v593_v34, %v561_v49 }
 0x245   :  { %578 = vst.msk [vmem:[%s1131_s6 + $0x38] sm:$0xff] %vm570_vm5, %v567_v48 }
 0x246   :  { %577 = vst.msk [vmem:[%s1131_s6 + $0x30] sm:$0xff] %vm570_vm5, %v562_v50 }

</bundles_post_ra>
